<compile_context>
chip_gen: v7x
topology: tpu7x:2x2x1
jax: 0.10.0
libtpu: 0.0.40
codegen_flags: <defaults>
</compile_context>

<pallas_src>
import functools

import jax
import jax.numpy as jnp
from jax.experimental import pallas as pl
from jax.experimental.pallas import tpu as pltpu

_LANE_CANDIDATES = (512, 256, 128)   # prefer widest lane dim that divides numel


def _tpu_generation_params():
    """Pick (vmem_limit_bytes, per-stream tile bytes, has-2-TensorCores)."""
    kind = ""
    try:
        kind = jax.devices()[0].device_kind.lower()
    except Exception:
        pass
    vmem_cap = None
    try:
        vmem_cap = int(pltpu.get_tpu_info().vmem_capacity_bytes)
    except Exception:
        pass

    if vmem_cap is not None:
        # 128 MiB chips (v5e/v6e) -> 64 MiB scoped; 64 MiB chips (v7x) -> 32 MiB.
        vmem_limit = min(vmem_cap // 2, 64 << 20)
    elif "v5" in kind or "v6" in kind:
        vmem_limit = 64 << 20
    else:
        vmem_limit = 32 << 20            # safe default (also the right cap for v7x)

    # Worst case is the weighted 'none' path: 4 f32 streams x 2 buffers.
    tile_bytes = vmem_limit // 10
    two_tc = "v7" in kind                # 2 TensorCores per chip only on v7x
    return vmem_limit, tile_bytes, two_tc


_VMEM_LIMIT, _TILE_BYTES, _TWO_TC = _tpu_generation_params()


# ---------------------------------------------------------------------------
# Kernels: elementwise ('none')
# ---------------------------------------------------------------------------
def _mse_none_kernel(p_ref, t_ref, o_ref, *, scale):
    d = p_ref[...].astype(jnp.float32) - t_ref[...].astype(jnp.float32)
    sq = d * d
    if scale != 1.0:                     # compile-time constant
        sq = jnp.float32(scale) * sq
    o_ref[...] = sq.astype(o_ref.dtype)


def _mse_none_w_kernel(p_ref, t_ref, w_ref, o_ref, *, scale):
    d = p_ref[...].astype(jnp.float32) - t_ref[...].astype(jnp.float32)
    sq = (d * d) * w_ref[...].astype(jnp.float32)
    if scale != 1.0:
        sq = jnp.float32(scale) * sq
    o_ref[...] = sq.astype(o_ref.dtype)


# ---------------------------------------------------------------------------
# Kernels: scalar reduction ('mean' / 'sum')
# ---------------------------------------------------------------------------
def _mse_reduce_single_kernel(p_ref, t_ref, o_ref, *, scale):
    d = p_ref[...].astype(jnp.float32) - t_ref[...].astype(jnp.float32)
    o_ref[0, 0] = jnp.float32(scale) * jnp.sum(d * d)


def _mse_reduce_single_w_kernel(p_ref, t_ref, w_ref, o_ref, *, scale):
    d = p_ref[...].astype(jnp.float32) - t_ref[...].astype(jnp.float32)
    o_ref[0, 0] = jnp.float32(scale) * jnp.sum(
        (d * d) * w_ref[...].astype(jnp.float32))


def _reduce_accumulate(sq, o_ref, acc_ref, *, scale, valid_rows,
                       blocks_per_split, tile_r, mask_from):
    """Accumulate a squared tile into a small (8, lanes) VMEM accumulator."""
    s = pl.program_id(0)          # parallel split (both TCs on v7x)
    j = pl.program_id(1)          # sequential blocks within the split
    blk = s * blocks_per_split + j
    folds = tile_r // 8

    @pl.when(j == 0)
    def _():
        acc_ref[...] = jnp.zeros_like(acc_ref)

    def fold(x):                  # (tile_r, lanes) -> (8, lanes), pure VALU adds
        return x.reshape(folds, 8, x.shape[-1]).sum(axis=0)

    if mask_from is None:
        # Statically known: every block of every split is fully in-bounds.
        acc_ref[...] += fold(sq)
    else:
        @pl.when(blk < mask_from)
        def _():                  # interior blocks: no masking cost
            acc_ref[...] += fold(sq)

        @pl.when(blk >= mask_from)
        def _():                  # boundary block and clamped overshoot blocks
            row0 = blk * tile_r   # NOTE: unclamped -> overshoot blocks zero out
            row_idx = row0 + jax.lax.broadcasted_iota(jnp.int32, sq.shape, 0)
            acc_ref[...] += fold(
                jnp.where(row_idx < valid_rows, sq, jnp.float32(0.0)))

    @pl.when(j == pl.num_programs(1) - 1)
    def _():
        o_ref[0, 0] = jnp.float32(scale) * jnp.sum(acc_ref[...])


def _mse_reduce_kernel(p_ref, t_ref, o_ref, acc_ref, *, scale, valid_rows,
                       blocks_per_split, tile_r, mask_from):
    d = p_ref[...].astype(jnp.float32) - t_ref[...].astype(jnp.float32)
    _reduce_accumulate(d * d, o_ref, acc_ref, scale=scale,
                       valid_rows=valid_rows, blocks_per_split=blocks_per_split,
                       tile_r=tile_r, mask_from=mask_from)


def _mse_reduce_w_kernel(p_ref, t_ref, w_ref, o_ref, acc_ref, *, scale,
                         valid_rows, blocks_per_split, tile_r, mask_from):
    d = p_ref[...].astype(jnp.float32) - t_ref[...].astype(jnp.float32)
    sq = (d * d) * w_ref[...].astype(jnp.float32)
    _reduce_accumulate(sq, o_ref, acc_ref, scale=scale,
                       valid_rows=valid_rows, blocks_per_split=blocks_per_split,
                       tile_r=tile_r, mask_from=mask_from)


# ---------------------------------------------------------------------------
# Wrapper
# ---------------------------------------------------------------------------
def _tail_sq(p_tail, t_tail, w_tail):
    d = p_tail.astype(jnp.float32) - t_tail.astype(jnp.float32)
    sq = d * d
    if w_tail is not None:
        sq = sq * w_tail.astype(jnp.float32)
    return sq


@functools.partial(jax.jit, static_argnames=("loss_weight", "reduction"))
def _mse_loss_impl(pred, target, weight=None, *, loss_weight, reduction):
    orig_shape = pred.shape
    n = pred.size
    has_weight = weight is not None

    # --- tiny tensors (< one lane row): not worth a kernel launch -----------
    if n < 128:
        # TODO(synk): sub-128-element tensors are computed in plain jnp.
        sq = _tail_sq(pred, target, weight if has_weight else None)
        if reduction == "none":
            return (jnp.float32(loss_weight) * sq).astype(pred.dtype)
        red = jnp.sum(sq) if reduction == "sum" else jnp.mean(sq)
        return (jnp.float32(loss_weight) * red).astype(pred.dtype)

    # --- 128-aligned main part (Pallas) + tiny jnp tail (no padded copies) --
    n_main = (n // 128) * 128
    tail = n - n_main

    p_flat = pred.reshape(-1)
    t_flat = target.reshape(-1)
    w_flat = weight.reshape(-1) if has_weight else None

    if tail:
        p_main, p_tail = p_flat[:n_main], p_flat[n_main:]
        t_main, t_tail = t_flat[:n_main], t_flat[n_main:]
        w_main = w_flat[:n_main] if has_weight else None
        w_tail = w_flat[n_main:] if has_weight else None
    else:
        p_main, t_main, w_main = p_flat, t_flat, w_flat
        p_tail = t_tail = w_tail = None

    lanes = next(l for l in _LANE_CANDIDATES if n_main % l == 0)
    rows = n_main // lanes
    p2 = p_main.reshape(rows, lanes)
    t2 = t_main.reshape(rows, lanes)
    w2 = w_main.reshape(rows, lanes) if has_weight else None

    # Tile rows: multiple of 8, sized from the generation-aware VMEM budget.
    tile_r = max(8, (_TILE_BYTES // (lanes * 4)) // 8 * 8)
    if rows <= tile_r:
        tile_r = rows                    # full extent -> always a legal block
        nb = 1
    else:
        nb = -(-rows // tile_r)          # boundary block handled in-kernel

    # ------------------------------ 'none' ---------------------------------
    if reduction == "none":
        kern = _mse_none_w_kernel if has_weight else _mse_none_kernel
        args = (p2, t2, w2) if has_weight else (p2, t2)
        tile = pl.BlockSpec((tile_r, lanes), lambda i: (i, 0))
        out2 = pl.pallas_call(
            functools.partial(kern, scale=loss_weight),
            out_shape=jax.ShapeDtypeStruct((rows, lanes), pred.dtype),
            grid_spec=pltpu.PrefetchScalarGridSpec(
                num_scalar_prefetch=0,
                grid=(nb,),
                in_specs=[tile] * len(args),
                out_specs=tile,
            ),
            compiler_params=pltpu.CompilerParams(
                dimension_semantics=("parallel",),
                vmem_limit_bytes=_VMEM_LIMIT,
            ),
        )(*args)
        out_flat = out2.reshape(-1)
        if tail:
            sq_t = _tail_sq(p_tail, t_tail, w_tail)
            out_tail = (jnp.float32(loss_weight) * sq_t).astype(pred.dtype)
            out_flat = jnp.concatenate([out_flat, out_tail])
        return out_flat.reshape(orig_shape)

    # --------------------------- 'mean' / 'sum' -----------------------------
    scale = loss_weight / n if reduction == "mean" else loss_weight

    if nb == 1:
        # Single block: reduce directly, no scratch accumulator, no masking.
        kern = (_mse_reduce_single_w_kernel if has_weight
                else _mse_reduce_single_kernel)
        args = (p2, t2, w2) if has_weight else (p2, t2)
        tile = pl.BlockSpec((rows, lanes), lambda i: (0, 0))
        partial = pl.pallas_call(
            functools.partial(kern, scale=scale),
            out_shape=jax.ShapeDtypeStruct((1, 1), jnp.float32),
            grid_spec=pltpu.PrefetchScalarGridSpec(
                num_scalar_prefetch=0,
                grid=(1,),
                in_specs=[tile] * len(args),
                out_specs=pl.BlockSpec((1, 1), lambda i: (0, 0),
                                       memory_space=pltpu.SMEM),
            ),
            compiler_params=pltpu.CompilerParams(
                dimension_semantics=("arbitrary",),
                vmem_limit_bytes=_VMEM_LIMIT,
            ),
        )(*args)
        total = partial[0, 0]
    else:
        # Only split the reduction across cores where there really are 2 TCs.
        nsplit = 2 if (_TWO_TC and nb >= 2) else 1
        bps = -(-nb // nsplit)           # blocks per split
        # First block index that needs the row mask (partial boundary block
        # and/or clamped overshoot iterations of the last split).
        mask_from = (nb - 1) if (rows % tile_r) != 0 else nb
        needs_mask = mask_from < nsplit * bps

        if nsplit * bps == nb:
            def in_map(s, j):
                return (s * bps + j, 0)
        else:
            def in_map(s, j):
                # Overshoot iterations re-read the last block; the in-kernel
                # row mask zeroes their contribution.
                return (jnp.minimum(s * bps + j, nb - 1), 0)

        tile = pl.BlockSpec((tile_r, lanes), in_map)
        kern = _mse_reduce_w_kernel if has_weight else _mse_reduce_kernel
        args = (p2, t2, w2) if has_weight else (p2, t2)

        partials = pl.pallas_call(
            functools.partial(
                kern, scale=scale, valid_rows=rows, blocks_per_split=bps,
                tile_r=tile_r, mask_from=mask_from if needs_mask else None),
            out_shape=jax.ShapeDtypeStruct((nsplit, 1), jnp.float32),
            grid_spec=pltpu.PrefetchScalarGridSpec(
                num_scalar_prefetch=0,
                grid=(nsplit, bps),
                in_specs=[tile] * len(args),
                out_specs=pl.BlockSpec((1, 1), lambda s, j: (s, 0),
                                       memory_space=pltpu.SMEM),
                scratch_shapes=[pltpu.VMEM((8, lanes), jnp.float32)],
            ),
            compiler_params=pltpu.CompilerParams(
                dimension_semantics=("parallel", "arbitrary"),
                vmem_limit_bytes=_VMEM_LIMIT,
            ),
        )(*args)
        total = jnp.sum(partials) if nsplit > 1 else partials[0, 0]

    if tail:
        total = total + jnp.float32(scale) * jnp.sum(
            _tail_sq(p_tail, t_tail, w_tail))
    return total.astype(pred.dtype)


class MSELoss:
    """JAX/Pallas equivalent of the PyTorch MSELoss module."""

    def __init__(self, loss_weight=1.0, reduction="mean"):
        if reduction not in ("none", "mean", "sum"):
            raise ValueError(f"Unsupported reduction mode: {reduction}")
        self.loss_weight = float(loss_weight)
        self.reduction = reduction

    def __call__(self, pred, target, weight=None, **kwargs):
        return _mse_loss_impl(
            pred, target, weight,
            loss_weight=self.loss_weight,
            reduction=self.reduction,
        )


# ---------------------------------------------------------------------------
# Demo / self-check
# ---------------------------------------------------------------------------
if __name__ == "__main__":
    key = jax.random.PRNGKey(0)
    k1, k2, k3, k4, k5, k6 = jax.random.split(key, 6)

    # --- small NCHW case, as in the PyTorch module docstring ---------------
    N, C, H, W = 2, 4, 16, 16
    pred = jax.random.normal(k1, (N, C, H, W), jnp.float32)
    target = jax.random.normal(k2, (N, C, H, W), jnp.float32)
    weight = jax.random.uniform(k3, (N, C, H, W), jnp.float32)

    out_mean = MSELoss(1.0, "mean")(pred, target)
    jax.block_until_ready(out_mean)
    assert jnp.allclose(out_mean, jnp.mean((pred - target) ** 2),
                        rtol=1e-5, atol=1e-5)

    out_sum = MSELoss(0.5, "sum")(pred, target, weight)
    jax.block_until_ready(out_sum)
    assert jnp.allclose(out_sum, 0.5 * jnp.sum(weight * (pred - target) ** 2),
                        rtol=1e-5, atol=1e-4)

    out_none = MSELoss(2.0, "none")(pred, target, weight)
    jax.block_until_ready(out_none)
    assert out_none.shape == (N, C, H, W)
    assert jnp.allclose(out_none, 2.0 * weight * (pred - target) ** 2,
                        rtol=1e-5, atol=1e-5)

    # --- awkward (non-128-divisible) shape: aligned-prefix kernel + jnp tail -
    pO = jax.random.normal(k4, (3, 5, 7, 11), jnp.float32)
    tO = jax.random.normal(k5, (3, 5, 7, 11), jnp.float32)
    wO = jax.random.uniform(k6, (3, 5, 7, 11), jnp.float32)
    out_odd = MSELoss(1.5, "none")(pO, tO, wO)
    jax.block_until_ready(out_odd)
    assert jnp.allclose(out_odd, 1.5 * wO * (pO - tO) ** 2, rtol=1e-5, atol=1e-5)
    out_odd_mean = MSELoss(1.0, "mean")(pO, tO)
    jax.block_until_ready(out_odd_mean)
    assert jnp.allclose(out_odd_mean, jnp.mean((pO - tO) ** 2),
                        rtol=1e-5, atol=1e-5)

    # --- bigger case: multi-block reduce grid, boundary masking, core split --
    pB = jax.random.normal(k1, (4, 8, 256, 256), jnp.float32)
    tB = jax.random.normal(k2, (4, 8, 256, 256), jnp.float32)
    wB = jax.random.uniform(k3, (4, 8, 256, 256), jnp.float32)
    out_big_mean = MSELoss(1.0, "mean")(pB, tB)
    jax.block_until_ready(out_big_mean)
    assert jnp.allclose(out_big_mean, jnp.mean((pB - tB) ** 2),
                        rtol=1e-4, atol=1e-4)
    out_big_sum = MSELoss(0.25, "sum")(pB, tB, wB)
    jax.block_until_ready(out_big_sum)
    assert jnp.allclose(out_big_sum, 0.25 * jnp.sum(wB * (pB - tB) ** 2),
                        rtol=1e-4, atol=1e-2)
    out_big_none = MSELoss(1.0, "none")(pB, tB)
    jax.block_until_ready(out_big_none)
    assert out_big_none.shape == pB.shape
    assert jnp.allclose(out_big_none, (pB - tB) ** 2, rtol=1e-5, atol=1e-5)

    print("KERNEL_OK")
</pallas_src>

<mosaic_0001>
module attributes {stable_mosaic.version = 11 : i64} {
  func.func @_mse_reduce_single_kernel(%arg0: i32, %arg1: memref<4x512xf32, #tpu.memory_space<vmem>>, %arg2: memref<4x512xf32, #tpu.memory_space<vmem>>, %arg3: memref<1x1xf32, #tpu.memory_space<smem>>) attributes {dimension_semantics = [#tpu.dimension_semantics<arbitrary>], iteration_bounds = array<i64: 1>, scalar_prefetch = 0 : i64, scratch_operands = 0 : i64, tpu.core_type = #tpu.core_type<tc>, window_params = [{pipeline_mode = #tpu.pipeline_mode<synchronous>, transform_indices = @transform_0, window_bounds = array<i64: 4, 512>}, {pipeline_mode = #tpu.pipeline_mode<synchronous>, transform_indices = @transform_1, window_bounds = array<i64: 4, 512>}, {transform_indices = @transform_2, window_bounds = array<i64: 1, 1>}]} {
    %c0 = arith.constant 0 : index
    %c0_0 = arith.constant 0 : index
    %0 = vector.load %arg1[%c0, %c0_0] : memref<4x512xf32, #tpu.memory_space<vmem>>, vector<4x512xf32>
    %c0_1 = arith.constant 0 : index
    %c0_2 = arith.constant 0 : index
    %1 = vector.load %arg2[%c0_1, %c0_2] : memref<4x512xf32, #tpu.memory_space<vmem>>, vector<4x512xf32>
    %2 = arith.subf %0, %1 : vector<4x512xf32>
    %3 = arith.mulf %2, %2 : vector<4x512xf32>
    %4 = vector.shape_cast %3 : vector<4x512xf32> to vector<1x4x512xf32>
    %cst = arith.constant dense<0.000000e+00> : vector<1xf32>
    %5 = vector.multi_reduction <add>, %4, %cst [1, 2] : vector<1x4x512xf32> to vector<1xf32>
    %6 = vector.shape_cast %5 : vector<1xf32> to vector<1x1x1xf32>
    %7 = vector.extract %6[0, 0, 0] : f32 from vector<1x1x1xf32>
    %cst_3 = arith.constant 4.8828125E-4 : f32
    %8 = arith.mulf %cst_3, %7 : f32
    %c0_4 = arith.constant 0 : index
    %c0_5 = arith.constant 0 : index
    %9 = memref.load %arg3[%c0_4, %c0_5] : memref<1x1xf32, #tpu.memory_space<smem>>
    memref.store %8, %arg3[%c0_4, %c0_5] : memref<1x1xf32, #tpu.memory_space<smem>>
    return
  }
  func.func @transform_0(%arg0: i32) -> (i32, i32) {
    %c0_i32 = arith.constant 0 : i32
    %c0_i32_0 = arith.constant 0 : i32
    %c0_i32_1 = arith.constant 0 : i32
    return %c0_i32, %c0_i32_0 : i32, i32
  }
  func.func @transform_1(%arg0: i32) -> (i32, i32) {
    %c0_i32 = arith.constant 0 : i32
    %c0_i32_0 = arith.constant 0 : i32
    %c0_i32_1 = arith.constant 0 : i32
    return %c0_i32, %c0_i32_0 : i32, i32
  }
  func.func @transform_2(%arg0: i32) -> (i32, i32) {
    %c0_i32 = arith.constant 0 : i32
    %c0_i32_0 = arith.constant 0 : i32
    %c0_i32_1 = arith.constant 0 : i32
    return %c0_i32, %c0_i32_0 : i32, i32
  }
}

</mosaic_0001>

<bundles_post_ra>
// kernel: _mse_loss_impl.1
= control target key start
LH: loop header
LB: loop body
LE: loop exit
PB: predicated region body
PF: predicated region fallthrough
CT: control target
= control target key end

     0   :  { %s114_s0 = inlined_call_operand.vmem [shape: f32[4,512], index: 0, kind: input, shape index: {}]   ;;  %s115_s1 = inlined_call_operand.vmem [shape: f32[4,512], index: 1, kind: input, shape index: {}]   ;;  %s116_s2 = inlined_call_operand.hbm [shape: f32[1,1], index: 2, kind: output, shape index: {}]  }
   0x1   :  { %v12_v0 = vld [vmem:[%s114_s0] sm:$0xff]  ;;  %v13_v1 = vld [vmem:[%s114_s0 + $0x8] sm:$0xff] }
   0x2   :  { %v14_v2 = vld [vmem:[%s115_s1] sm:$0xff]  ;;  %v15_v3 = vld [vmem:[%s115_s1 + $0x8] sm:$0xff] }
   0x3   :  { %v16_v4 = vsub.f32 %v12_v0, %v14_v2 }
   0x4   :  { %7 = vsyncpa [#allocation3], 0  ;;  %v17_v5 = vsub.f32 %v13_v1, %v15_v3  ;;  %vm26_vm0 = vcmask 1043456   ;;  %s62_s19 = scalar_lea.hbm %s116_s2, 16 }
   0x5   :  { %v18_v6 = vmul.f32 %v16_v4, %v16_v4  ;;  %p63_p0 = scmp.ne.s32.totalorder %s116_s2, %s62_s19  ;;  %p66_p1 = scmp.lt.u32.totalorder %s62_s19, %s116_s2 }
   0x6   :  { %v19_v7 = vmul.f32 %v17_v5, %v17_v5 }
   0x7   :  { %v22_v8 = vcombine.high %v18_v6, %v18_v6  ;;  %v27_v9 = vsel %vm26_vm0, %v18_v6, 0.0  ;;  %p68_p2 = pnand %p66_p1, %p63_p0 }
   0x8   :  { %v23_v10 = vcombine.high %v19_v7, %v19_v7  ;;  %v30_v12 = vsel %vm26_vm0, %v19_v7, 0.0 }
   0x9   :  { %v28_v11 = vsel %vm26_vm0, %v22_v8, 0.0 }
   0xa   :  { %v29_v13 = vadd.f32 %v28_v11, %v27_v9  ;;  %v32_v14 = vsel %vm26_vm0, %v23_v10, 0.0 }
   0xc   :  { %v31_v15 = vadd.f32 %v30_v12, %v29_v13 }
   0xe   :  { %v33_v16 = vadd.f32 %v32_v14, %v31_v15 }
  0x10   :  { %34 = vadd.xlane.f32.xlu0 %v33_v16 }
  0x9d   :  { %v35_v17 = vpop.xlane.xlu0 %34 }
  0x9e   :  { %v36_v18 = vrot.slane %v35_v17, 4 }
  0xa0   :  { %v37_v19 = vadd.f32 %v36_v18, %v35_v17 }
  0xa2   :  { %v38_v20 = vrot.slane %v37_v19, 2 }
  0xa4   :  { %v39_v21 = vadd.f32 %v38_v20, %v37_v19 }
  0xa6   :  { %v40_v22 = vrot.slane %v39_v21, 1 }
  0xa8   :  { %v41_v23 = vadd.f32 %v40_v22, %v39_v21 }
  0xaa   :  { %59 = vpush %v41_v23 }
  0xdb   :  { %s60_s0 = spop %59 }
  0xdc   :  { %s43_s1 = smul.f32 0.00048828125, %s60_s0 }
  0xde   :  { %45 = sst [smem:[#allocation2]] %s43_s1 }
  0xdf   :  { %71 = shalt.err (!%p68_p2)
}
  0xe0   :  { %s74_s24 = smov [#allocation2]  }
  0xe1   :  { %53 = dma.smem_to_hbm %s74_s24, 16, %s116_s2, [#allocation3]  }
  0xe2   :  { %72 = dma.done.wait [#allocation3], 16  }
  0xe3   :  { %73 = vsyncadd [#allocation3], 4294967280 }
  0xe4   :  { %57 = sfence }
  0xe5   :  { %58 = vsyncpa [#allocation3], 1 }

</bundles_post_ra>
